<compile_context>
chip_gen: v6e
topology: v6e:2x2x1
jax: 0.10.0
libtpu: 0.0.40
codegen_flags: <defaults>
</compile_context>

<pallas_src>
import jax
import jax.numpy as jnp
from jax.experimental import pallas as pl
from jax.experimental.pallas import tpu as pltpu


# ----------------------------------------------------------------------------
# Kernel 1: per-channel sum / sum-of-squares (BatchNorm batch statistics)
# ----------------------------------------------------------------------------
def _stats_kernel(x_ref, sum_ref, ssq_ref):
    # x_ref: (C, TILE) slice of x viewed as (B, C, D*H*W); outputs: (C, 1) per batch b.
    @pl.when(pl.program_id(1) == 0)
    def _init():
        sum_ref[...] = jnp.zeros_like(sum_ref)
        ssq_ref[...] = jnp.zeros_like(ssq_ref)

    x = x_ref[...].astype(jnp.float32)
    sum_ref[...] += jnp.sum(x, axis=1, keepdims=True)
    ssq_ref[...] += jnp.sum(x * x, axis=1, keepdims=True)


def _pick_lane_tile(s, max_tile=8192):
    """Largest legal lane tile: full S if small, else a 128-multiple divisor of S."""
    if s <= max_tile:
        return s
    t = (max_tile // 128) * 128
    while t >= 128:
        if s % t == 0:
            return t
        t -= 128
    return s  # fallback: single full-width tile (always a legal block)


def _batchnorm_stats(x_flat):
    """x_flat: (B, C, S) -> per-channel (sum, sum_sq) reduced over (B, S)."""
    B, C, S = x_flat.shape
    tile = _pick_lane_tile(S)
    sums, ssqs = pl.pallas_call(
        _stats_kernel,
        out_shape=(jax.ShapeDtypeStruct((B, C, 1), jnp.float32),
                   jax.ShapeDtypeStruct((B, C, 1), jnp.float32)),
        grid_spec=pltpu.PrefetchScalarGridSpec(
            num_scalar_prefetch=0,
            grid=(B, S // tile),
            in_specs=[pl.BlockSpec((None, C, tile), lambda b, t: (b, 0, t))],
            out_specs=(pl.BlockSpec((None, C, 1), lambda b, t: (b, 0, 0)),
                       pl.BlockSpec((None, C, 1), lambda b, t: (b, 0, 0))),
        ),
        compiler_params=pltpu.CompilerParams(
            dimension_semantics=("parallel", "arbitrary")),
    )(x_flat)
    total = jnp.sum(sums, axis=0).reshape(C)
    total_sq = jnp.sum(ssqs, axis=0).reshape(C)
    return total, total_sq


# ----------------------------------------------------------------------------
# Kernel 2: fused BatchNorm + ReLU + Conv3d(3x3x3, stride 1, padding 1)
# ----------------------------------------------------------------------------
def graph_attention3d_forward(features, gamma, beta, conv_w, conv_b, *, eps=1e-5):
    """features: (B, C, D, H, W) NCDHW, C == landmarksNum.
    Returns Conv3d(ReLU(BatchNorm3d(features))) with the module's parameters."""
    B, C, D, H, W = features.shape
    Cout = conv_w.shape[0]
    M = H * W                      # flattened spatial plane -> lane axis
    S = D * M

    # ---- BatchNorm batch statistics (one streaming pass over x) -------------
    total, total_sq = _batchnorm_stats(features.reshape(B, C, S))
    cnt = jnp.float32(B * S)
    mean = total / cnt
    var = jnp.maximum(total_sq / cnt - mean * mean, 0.0)   # biased variance (PyTorch BN)
    scale = gamma.astype(jnp.float32) * jax.lax.rsqrt(var + eps)
    shift = beta.astype(jnp.float32) - mean * scale

    # ---- prepared small operands --------------------------------------------
    # conv weight rearranged to (27, Cout, Cin): tap-major, channels on (sublane, lane).
    w27 = jnp.transpose(conv_w, (2, 3, 4, 0, 1)).reshape(27, Cout, C).astype(jnp.float32)
    b_col = conv_b.reshape(Cout, 1).astype(jnp.float32)
    scale3 = scale.reshape(C, 1, 1)
    shift3 = shift.reshape(C, 1, 1)
    # lane wrap masks for W-shifts of the flattened plane (0 where the shifted column
    # would wrap into the neighbouring row).
    w_idx = jnp.arange(M, dtype=jnp.int32) % W
    wrap_masks = jnp.stack([(w_idx != 0), (w_idx != (W - 1))]).astype(jnp.float32)  # (2, M)

    # spatially padded scratch plane: PAD >= W+1 zeros on each side of the flat plane.
    PAD = ((W + 1 + 127) // 128) * 128
    L = M + 2 * PAD

    def conv_kernel(x_ref, scale_ref, shift_ref, w_ref, b_ref, mask_ref, o_ref, ap_ref):
        # x_ref : (C, D, M)      resident per batch element
        # o_ref : (Cout, D, M)   resident per batch element
        # ap_ref: (C, 3, L)      VMEM scratch, padded depth-window planes
        d = pl.program_id(1)

        @pl.when(d == 0)
        def _zero_scratch():
            # zero once per batch element so the halo margins stay zero
            ap_ref[...] = jnp.zeros_like(ap_ref)

        scl = scale_ref[...]      # (C, 1, 1)
        sft = shift_ref[...]      # (C, 1, 1)

        # Stage the three BN+ReLU'd depth planes into the padded scratch
        # (out-of-range depths become zero planes -> conv zero padding in D).
        for kd in range(3):
            dd = d + (kd - 1)
            dd_c = jnp.clip(dd, 0, D - 1)
            xp = x_ref[:, pl.ds(dd_c, 1), :].astype(jnp.float32)     # (C, 1, M)
            act = jnp.maximum(xp * scl + sft, 0.0)
            valid = jnp.where(jnp.logical_and(dd >= 0, dd < D), 1.0, 0.0)
            ap_ref[:, kd:kd + 1, PAD:PAD + M] = act * valid

        w_all = w_ref[...]                       # (27, Cout, C)
        m_lo = mask_ref[0:1, :]                  # (1, M): 0 where w == 0
        m_hi = mask_ref[1:2, :]                  # (1, M): 0 where w == W-1

        acc = jnp.zeros((Cout, M), jnp.float32)
        for kd in range(3):
            for kh in range(3):
                for kw in range(3):
                    t = (kd * 3 + kh) * 3 + kw
                    s = (kh - 1) * W + (kw - 1)
                    xs = ap_ref[:, kd, PAD + s:PAD + s + M]          # (C, M)
                    if kw == 0:
                        xs = xs * m_lo
                    elif kw == 2:
                        xs = xs * m_hi
                    wk = w_all[t]                                    # (Cout, C)
                    for ci in range(C):
                        acc = acc + wk[:, ci:ci + 1] * xs[ci:ci + 1, :]

        out = acc + b_ref[...]                                       # (Cout, M)
        o_ref[:, pl.ds(d, 1), :] = out[:, None, :].astype(o_ref.dtype)

    x4 = features.reshape(B, C, D, M)           # free reshape, stays channels-first
    flops = 2 * B * D * M * Cout * C * 27 + 4 * B * C * D * M
    bytes_accessed = 4 * (B * C * D * M + B * Cout * D * M) + 4 * (27 * Cout * C + 4 * C + 2 * Cout + 2 * M)

    y4 = pl.pallas_call(
        conv_kernel,
        out_shape=jax.ShapeDtypeStruct((B, Cout, D, M), features.dtype),
        grid_spec=pltpu.PrefetchScalarGridSpec(
            num_scalar_prefetch=0,
            grid=(B, D),
            in_specs=[
                pl.BlockSpec((None, C, D, M), lambda b, d: (b, 0, 0, 0)),   # x (resident per b)
                pl.BlockSpec((C, 1, 1), lambda b, d: (0, 0, 0)),            # BN scale
                pl.BlockSpec((C, 1, 1), lambda b, d: (0, 0, 0)),            # BN shift
                pl.BlockSpec((27, Cout, C), lambda b, d: (0, 0, 0)),        # conv weight
                pl.BlockSpec((Cout, 1), lambda b, d: (0, 0)),               # conv bias
                pl.BlockSpec((2, M), lambda b, d: (0, 0)),                  # wrap masks
            ],
            out_specs=pl.BlockSpec((None, Cout, D, M), lambda b, d: (b, 0, 0, 0)),
            scratch_shapes=[pltpu.VMEM((C, 3, L), jnp.float32)],
        ),
        compiler_params=pltpu.CompilerParams(
            dimension_semantics=("parallel", "arbitrary"),
            vmem_limit_bytes=32 * 1024 * 1024),
        cost_estimate=pl.CostEstimate(flops=flops, transcendentals=0,
                                      bytes_accessed=bytes_accessed),
    )(x4, scale3, shift3, w27, b_col, wrap_masks)

    return y4.reshape(B, Cout, D, H, W)


# ----------------------------------------------------------------------------
if __name__ == "__main__":
    landmarks = 4                 # landmarksNum == channel count of the 3x3x3 conv
    B, D, H, W = 2, 4, 16, 16     # small demo shapes; H*W is lane-dense (256)
    eps = 1e-5

    key = jax.random.PRNGKey(0)
    kx, kg, kb, kw, kc = jax.random.split(key, 5)

    x = jax.random.normal(kx, (B, landmarks, D, H, W), dtype=jnp.float32)
    gamma = 1.0 + 0.1 * jax.random.normal(kg, (landmarks,), dtype=jnp.float32)
    beta = 0.1 * jax.random.normal(kb, (landmarks,), dtype=jnp.float32)
    fan_in = landmarks * 27
    bound = 1.0 / (fan_in ** 0.5)
    conv_w = jax.random.uniform(kw, (landmarks, landmarks, 3, 3, 3),
                                minval=-bound, maxval=bound, dtype=jnp.float32)
    conv_b = jax.random.uniform(kc, (landmarks,), minval=-bound, maxval=bound,
                                dtype=jnp.float32)

    y = graph_attention3d_forward(x, gamma, beta, conv_w, conv_b, eps=eps)
    jax.block_until_ready(y)

    # Pure-JAX reference: BatchNorm3d(track_running_stats=False) -> ReLU -> Conv3d(3,1,1).
    mean = x.mean(axis=(0, 2, 3, 4))
    var = x.var(axis=(0, 2, 3, 4))
    xh = (x - mean[None, :, None, None, None]) * jax.lax.rsqrt(var + eps)[None, :, None, None, None]
    a = jnp.maximum(xh * gamma[None, :, None, None, None] + beta[None, :, None, None, None], 0.0)
    ref = jax.lax.conv_general_dilated(
        a, conv_w, window_strides=(1, 1, 1),
        padding=((1, 1), (1, 1), (1, 1)),
        dimension_numbers=("NCDHW", "OIDHW", "NCDHW"),
        precision=jax.lax.Precision.HIGHEST,
    ) + conv_b[None, :, None, None, None]

    assert y.shape == (B, landmarks, D, H, W)
    err = float(jnp.max(jnp.abs(y - ref)))
    assert jnp.allclose(y, ref, atol=1e-4, rtol=1e-4), f"max abs err = {err}"

    print("KERNEL_OK")
</pallas_src>

<mosaic_0001>
module attributes {stable_mosaic.version = 11 : i64} {
  func.func @_stats_kernel(%arg0: i32, %arg1: i32, %arg2: memref<1x4x1024xf32, #tpu.memory_space<vmem>>, %arg3: memref<1x4x1xf32, #tpu.memory_space<vmem>>, %arg4: memref<1x4x1xf32, #tpu.memory_space<vmem>>) attributes {dimension_semantics = [#tpu.dimension_semantics<parallel>, #tpu.dimension_semantics<arbitrary>], iteration_bounds = array<i64: 2, 1>, scalar_prefetch = 0 : i64, scratch_operands = 0 : i64, tpu.core_type = #tpu.core_type<tc>, window_params = [{transform_indices = @transform_0, window_bounds = array<i64: 1, 4, 1024>}, {transform_indices = @transform_1, window_bounds = array<i64: 1, 4, 1>}, {transform_indices = @transform_2, window_bounds = array<i64: 1, 4, 1>}]} {
    %c0_i32 = arith.constant 0 : i32
    %0 = arith.cmpi eq, %arg1, %c0_i32 : i32
    %1 = arith.extui %0 : i1 to i32
    %c0_i32_0 = arith.constant 0 : i32
    %2 = arith.cmpi ne, %1, %c0_i32_0 : i32
    scf.if %2 {
      %cst_16 = arith.constant 0.000000e+00 : f32
      %22 = vector.broadcast %cst_16 : f32 to vector<4x1xf32>
      %c0_17 = arith.constant 0 : index
      %c0_18 = arith.constant 0 : index
      %c0_19 = arith.constant 0 : index
      %23 = vector.load %arg3[%c0_17, %c0_18, %c0_19] : memref<1x4x1xf32, #tpu.memory_space<vmem>>, vector<1x4x1xf32>
      %24 = vector.shape_cast %23 : vector<1x4x1xf32> to vector<4x1xf32>
      %25 = vector.shape_cast %22 : vector<4x1xf32> to vector<1x4x1xf32>
      tpu.vector_store %arg3[%c0_17, %c0_18, %c0_19], %25 {strides = array<i32>} : memref<1x4x1xf32, #tpu.memory_space<vmem>>, vector<1x4x1xf32>,
      %cst_20 = arith.constant 0.000000e+00 : f32
      %26 = vector.broadcast %cst_20 : f32 to vector<4x1xf32>
      %c0_21 = arith.constant 0 : index
      %c0_22 = arith.constant 0 : index
      %c0_23 = arith.constant 0 : index
      %27 = vector.load %arg4[%c0_21, %c0_22, %c0_23] : memref<1x4x1xf32, #tpu.memory_space<vmem>>, vector<1x4x1xf32>
      %28 = vector.shape_cast %27 : vector<1x4x1xf32> to vector<4x1xf32>
      %29 = vector.shape_cast %26 : vector<4x1xf32> to vector<1x4x1xf32>
      tpu.vector_store %arg4[%c0_21, %c0_22, %c0_23], %29 {strides = array<i32>} : memref<1x4x1xf32, #tpu.memory_space<vmem>>, vector<1x4x1xf32>,
    } else {
    }
    %c0 = arith.constant 0 : index
    %c0_1 = arith.constant 0 : index
    %c0_2 = arith.constant 0 : index
    %3 = vector.load %arg2[%c0, %c0_1, %c0_2] : memref<1x4x1024xf32, #tpu.memory_space<vmem>>, vector<1x4x1024xf32>
    %4 = vector.shape_cast %3 : vector<1x4x1024xf32> to vector<4x1024xf32>
    %c0_3 = arith.constant 0 : index
    %c0_4 = arith.constant 0 : index
    %c0_5 = arith.constant 0 : index
    %5 = vector.load %arg3[%c0_3, %c0_4, %c0_5] : memref<1x4x1xf32, #tpu.memory_space<vmem>>, vector<1x4x1xf32>
    %6 = vector.shape_cast %5 : vector<1x4x1xf32> to vector<4x1xf32>
    %cst = arith.constant dense<0.000000e+00> : vector<4xf32>
    %7 = vector.multi_reduction <add>, %4, %cst [1] : vector<4x1024xf32> to vector<4xf32>
    %8 = vector.shape_cast %7 : vector<4xf32> to vector<4x1xf32>
    %9 = arith.addf %6, %8 : vector<4x1xf32>
    %c0_6 = arith.constant 0 : index
    %c0_7 = arith.constant 0 : index
    %c0_8 = arith.constant 0 : index
    %10 = vector.load %arg3[%c0_6, %c0_7, %c0_8] : memref<1x4x1xf32, #tpu.memory_space<vmem>>, vector<1x4x1xf32>
    %11 = vector.shape_cast %10 : vector<1x4x1xf32> to vector<4x1xf32>
    %12 = vector.shape_cast %9 : vector<4x1xf32> to vector<1x4x1xf32>
    tpu.vector_store %arg3[%c0_6, %c0_7, %c0_8], %12 {strides = array<i32>} : memref<1x4x1xf32, #tpu.memory_space<vmem>>, vector<1x4x1xf32>,
    %c0_9 = arith.constant 0 : index
    %c0_10 = arith.constant 0 : index
    %c0_11 = arith.constant 0 : index
    %13 = vector.load %arg4[%c0_9, %c0_10, %c0_11] : memref<1x4x1xf32, #tpu.memory_space<vmem>>, vector<1x4x1xf32>
    %14 = vector.shape_cast %13 : vector<1x4x1xf32> to vector<4x1xf32>
    %15 = arith.mulf %4, %4 : vector<4x1024xf32>
    %cst_12 = arith.constant dense<0.000000e+00> : vector<4xf32>
    %16 = vector.multi_reduction <add>, %15, %cst_12 [1] : vector<4x1024xf32> to vector<4xf32>
    %17 = vector.shape_cast %16 : vector<4xf32> to vector<4x1xf32>
    %18 = arith.addf %14, %17 : vector<4x1xf32>
    %c0_13 = arith.constant 0 : index
    %c0_14 = arith.constant 0 : index
    %c0_15 = arith.constant 0 : index
    %19 = vector.load %arg4[%c0_13, %c0_14, %c0_15] : memref<1x4x1xf32, #tpu.memory_space<vmem>>, vector<1x4x1xf32>
    %20 = vector.shape_cast %19 : vector<1x4x1xf32> to vector<4x1xf32>
    %21 = vector.shape_cast %18 : vector<4x1xf32> to vector<1x4x1xf32>
    tpu.vector_store %arg4[%c0_13, %c0_14, %c0_15], %21 {strides = array<i32>} : memref<1x4x1xf32, #tpu.memory_space<vmem>>, vector<1x4x1xf32>,
    return
  }
  func.func @transform_0(%arg0: i32, %arg1: i32) -> (i32, i32, i32) {
    %c0_i32 = arith.constant 0 : i32
    %c0_i32_0 = arith.constant 0 : i32
    return %arg0, %c0_i32, %arg1 : i32, i32, i32
  }
  func.func @transform_1(%arg0: i32, %arg1: i32) -> (i32, i32, i32) {
    %c0_i32 = arith.constant 0 : i32
    %c0_i32_0 = arith.constant 0 : i32
    %c0_i32_1 = arith.constant 0 : i32
    return %arg0, %c0_i32, %c0_i32_0 : i32, i32, i32
  }
  func.func @transform_2(%arg0: i32, %arg1: i32) -> (i32, i32, i32) {
    %c0_i32 = arith.constant 0 : i32
    %c0_i32_0 = arith.constant 0 : i32
    %c0_i32_1 = arith.constant 0 : i32
    return %arg0, %c0_i32, %c0_i32_0 : i32, i32, i32
  }
}

</mosaic_0001>

<bundles_post_ra>
// kernel: tpu_custom_call.1
= control target key start
LH: loop header
LB: loop body
LE: loop exit
PB: predicated region body
PF: predicated region fallthrough
CT: control target
= control target key end

     0   :  { %8 = vsyncpa [#allocation3], 0  ;;  %s682_s0 = inlined_call_operand.hbm [shape: f32[2,4,1024], index: 0, kind: input, shape index: {}]   ;;  %s683_s1 = inlined_call_operand.vmem [shape: f32[2,4,1], index: 1, kind: output, shape index: {0}]   ;;  %s684_s2 = inlined_call_operand.vmem [shape: f32[2,4,1], index: 2, kind: output, shape index: {1}]  }
   0x1   :  { %10 = vsyncpa [#allocation3 + $0x1], 0  ;;  %s547_s9 = smov 0   ;;  %s549_s10 = smov 0  }
   0x2   :  { %s551_s11 = smov 0   ;;  %s553_s12 = smov 0  }
   0x3   :  { %s555_s13 = smov 0   ;;  %s557_s14 = smov 0  }
   0x4 LB: > { %s376_s15 = sadd.s32 4294967295, %s528_s14   ;;  %s28_s16 = sadd.s32 1, %s524_s13  ;;  %s528_s14 = sphi %s557_s14, %s16_s14   ;;  %s524_s13 = sphi %s555_s13, %s692_s13   ;;  %s520_s12 = sphi %s553_s12, %s691_s12   ;;  %s516_s11 = sphi %s551_s11, %s690_s11   ;;  %s512_s10 = sphi %s549_s10, %s689_s10   ;;  %s508_s9 = sphi %s547_s9, %s688_s9  }
   0x5   : > { %p30_p0 = scmp.ge.s32.totalorder %s28_s16, 2  ;;  %s37_s17 = sadd.s32 1, %s516_s11 }
   0x6   : > { %p44_p1 = scmp.ne.s32.totalorder %s516_s11, %s512_s10  ;;  %p45_p2 = scmp.eq.s32.totalorder %s528_s14, 0 }
   0x7   : > { %s694_s16 = smov (%p30_p0, %s28_s16), 0  ;;  %p50_p4 = scmp.ne.s32.totalorder %s512_s10, %s508_s9 }
   0x8   : > { %p583_p3 = por %p45_p2, %p44_p1  ;;  %s32_s19 = ssub.s32 %s524_s13, %s694_s16 }
   0x9   : > { %p51_p5 = scmp.eq.s32.totalorder %s376_s15, 0  ;;  %p35_p6 = scmp.eq.s32.totalorder %s32_s19, 0 }
   0xa   : > { %p396_p8 = scmp.lt.s32.totalorder %s528_s14, 2  ;;  %s126_s22 = sand.u32 1, %s516_s11  }
   0xb   : > { %p590_p7 = por %p51_p5, %p50_p4  ;;  %s389_s23 = sshll.u32 %s524_s13, 9 }
   0xc   : > { %s596_s21 = scalar_select %p35_p6, %s516_s11, %s37_s17  }
   0xd   : > { %s380_s24 = sshll.u32 %s126_s22, 5  ;;  %s138_s27 = scalar_lea.hbm %s682_s0, %s389_s23 }
   0xe   : > { %s130_s28 = scalar_lea.vmem [#allocation2], %s380_s24  ;;  %p605_p9 = pnand %p396_p8, %p583_p3 }
   0xf   : > { %s140_s29 = sshll.u32 %s130_s28, 4  ;;  %p383_p10 = scmp.ge.s32.totalorder %s528_s14, 1  ;;  %s141_s29 = int_to_ptr.vmem [resolvable:$true] %s140_s29 }
  0x10   : > { %p145_p11 = scmp.lt.s32.totalorder %s528_s14, 3  ;;  %s127_s3 = scalar_lea.sflag [#allocation3], %s126_s22 }
  0x11   : > { %p452_p12 = pneg %p605_p9  ;;  %s463_s4 = scalar_lea.vmem %s141_s29, 512 }
  0x12   : > { %p464_p13 = scmp.ne.s32.totalorder %s141_s29, %s463_s4  ;;  %s530_s5 = smov [#allocation2]  }
  0x13   : > { %s468_s6 = sshll.u32 %s530_s5, 4  ;;  %s469_s6 = int_to_ptr.vmem [resolvable:$false] %s468_s6 }
  0x14   : > { %p466_p0 = pnand %p464_p13, %p452_p12  ;;  %s470_s7 = scalar_lea.vmem %s469_s6, 1024 }
  0x15   : > { %p471_p2 = scmp.lt.s32.totalorder %s141_s29, %s469_s6  ;;  %p472_p3 = scmp.lt.s32.totalorder %s470_s7, %s463_s4 }
  0x16   : > { %p467_p1 = pneg %p466_p0 }
  0x17   : > { %p473_p4 = por %p472_p3, %p471_p2 }
  0x19   : > { %p474_p5 = pnand %p473_p4, %p467_p1 }
  0x1b   : > { %477 = shalt.err (!%p474_p5)
}
  0x1c   : > { %395 = dma.hbm_to_vmem [thread:$0]  (!%p605_p9), %s138_s27, 512, %s141_s29, %s127_s3  }
  0x1d   : > { %p146_p6 = pnand %p383_p10, %p145_p11 }
  0x1e   : > { %s151_s8 = sand.u32 (!%p146_p6), 1, %s512_s10  }
  0x1f   : > { %149 = sbr.rel (%p146_p6) target bundleno = 200 (0xc8), region = 24  ;;  %s384_s9 = sshll.u32 (!%p146_p6), %s151_s8, 5 }
  0x20   : > { %s152_s15 = scalar_lea.sflag (!%p146_p6), [#allocation3], %s151_s8  ;;  %s155_s17 = scalar_lea.vmem (!%p146_p6), [#allocation2], %s384_s9 }
  0x24   : > { %503 = dma.done.wait (%p590_p7), %s152_s15, 512  }
  0x25   : > { %505 = vsyncadd (%p590_p7), %s152_s15, 4294966784  ;;  %p180_p8 = scmp.lt.s32.totalorder %s520_s12, 1  ;;  %vm192_vm0 = vcmask 3072   ;;  %vm212_vm1 = vcmask 1043456   ;;  %v531_v0 = vmov 0.0   ;;  %v195_v1 = vld [vmem:[%s155_s17] sm:$0xff] }
  0x26   : > { %v196_v2 = vld [vmem:[%s155_s17 + $0x8] sm:$0xff]  ;;  %v197_v3 = vld [vmem:[%s155_s17 + $0x10] sm:$0xff]  ;;  %v204_v4 = vcombine.high %v195_v1, %v195_v1  ;;  %v213_v6 = vsel %vm212_vm1, %v195_v1, 0.0  ;;  %v234_v9 = vmul.f32 %v195_v1, %v195_v1  ;;  %v198_v13 = vld [vmem:[%s155_s17 + $0x18] sm:$0xff] }
  0x27   : > { %s696_s12 = smov (!%p180_p8, %s520_s12), 1  ;;  %v205_v5 = vcombine.high %v196_v2, %v196_v2  ;;  %v216_v8 = vsel %vm212_vm1, %v196_v2, 0.0  ;;  %v206_v10 = vcombine.high %v197_v3, %v197_v3  ;;  %v235_v12 = vmul.f32 %v196_v2, %v196_v2 }
  0x28   : > { %s385_s18 = sshll.u32 %s696_s12, 2  ;;  %v214_v7 = vsel %vm212_vm1, %v204_v4, 0.0  ;;  %v236_v15 = vmul.f32 %v197_v3, %v197_v3  ;;  %v242_v16 = vcombine.high %v234_v9, %v234_v9  ;;  %v250_v17 = vsel %vm212_vm1, %v234_v9, 0.0 }
  0x29   : > { %s634_s23 = scalar_lea.vmem %s683_s1, %s385_s18  ;;  %v215_v11 = vadd.f32 %v214_v7, %v213_v6  ;;  %v218_v14 = vsel %vm212_vm1, %v205_v5, 0.0  ;;  %v243_v19 = vcombine.high %v235_v12, %v235_v12  ;;  %v220_v20 = vsel %vm212_vm1, %v197_v3, 0.0  ;;  %s187_s25 = scalar_lea.vmem %s684_s2, %s385_s18 }
  0x2a   : > { %193 = vst.msk [vmem:[%s634_s23] sm:$0xf] %vm192_vm0, %v531_v0  ;;  %v251_v21 = vsel %vm212_vm1, %v242_v16, 0.0  ;;  %v253_v22 = vsel %vm212_vm1, %v235_v12, 0.0  ;;  %v207_v23 = vcombine.high %v198_v13, %v198_v13  ;;  %v222_v26 = vsel %vm212_vm1, %v206_v10, 0.0 }
  0x2b   : > { %v217_v18 = vadd.f32 %v216_v8, %v215_v11  ;;  %v252_v25 = vadd.f32 %v251_v21, %v250_v17  ;;  %v237_v27 = vmul.f32 %v198_v13, %v198_v13  ;;  %v244_v28 = vcombine.high %v236_v15, %v236_v15  ;;  %194 = vst.msk [vmem:[%s187_s25] sm:$0xf] %vm192_vm0, %v531_v0 }
  0x2c   : > { %v255_v29 = vsel %vm212_vm1, %v243_v19, 0.0  ;;  %v224_v32 = vsel %vm212_vm1, %v198_v13, 0.0  ;;  %v257_v33 = vsel %vm212_vm1, %v236_v15, 0.0  ;;  %v226_v36 = vsel %vm212_vm1, %v207_v23, 0.0 }
  0x2d   : > { %v219_v24 = vadd.f32 %v218_v14, %v217_v18  ;;  %v254_v31 = vadd.f32 %v253_v22, %v252_v25  ;;  %v245_v37 = vcombine.high %v237_v27, %v237_v27  ;;  %v259_v38 = vsel %vm212_vm1, %v244_v28, 0.0 }
  0x2e   : > { %v261_v41 = vsel %vm212_vm1, %v237_v27, 0.0 }
  0x2f   : > { %v221_v30 = vadd.f32 %v220_v20, %v219_v24  ;;  %v256_v35 = vadd.f32 %v255_v29, %v254_v31  ;;  %v263_v44 = vsel %vm212_vm1, %v245_v37, 0.0 }
  0x31   : > { %v223_v34 = vadd.f32 %v222_v26, %v221_v30  ;;  %v258_v40 = vadd.f32 %v257_v33, %v256_v35  ;;  %v199_v47 = vld [vmem:[%s634_s23] sm:$0xf] }
  0x32   : > { %v233_v50 = vld [vmem:[%s187_s25] sm:$0xf] }
  0x33   : > { %v225_v39 = vadd.f32 %v224_v32, %v223_v34  ;;  %v260_v43 = vadd.f32 %v259_v38, %v258_v40 }
  0x35   : > { %v227_v42 = vadd.f32 %v226_v36, %v225_v39  ;;  %v262_v45 = vadd.f32 %v261_v41, %v260_v43 }
  0x37   : > { %228 = vadd.xlane.f32.xlu0 %v227_v42  ;;  %v264_v46 = vadd.f32 %v263_v44, %v262_v45 }
  0x3b   : > { %265 = vadd.xlane.f32.xlu0 %v264_v46 }
  0xc0   : > { %v229_v48 = vpop.xlane.xlu0 %228 }
  0xc1   : > { %v230_v49 = vadd.f32 %v229_v48, %v199_v47 }
  0xc3   : > { %232 = vst.msk [vmem:[%s634_s23] sm:$0xf] %vm192_vm0, %v230_v49 }
  0xc4   : > { %v266_v51 = vpop.xlane.xlu0 %265 }
  0xc5   : > { %v267_v52 = vadd.f32 %v266_v51, %v233_v50 }
  0xc7   : > { %268 = vst.msk [vmem:[%s187_s25] sm:$0xf] %vm192_vm0, %v267_v52 }
  0xc8 PF: > { %s16_s14 = sadd.s32 1, %s528_s14   ;;  %s688_s9 = smov %s512_s10 }
  0xc9   : > { %p13_p7 = scmp.ge.s32.totalorder %s16_s14, 4   ;;  %s689_s10 = smov %s516_s11 }
  0xca   : > { %s690_s11 = smov %s596_s21  ;;  %s691_s12 = smov %s524_s13 }
  0xcb   : > { %s692_s13 = smov %s694_s16  ;;  %15 = sbr.rel (!%p13_p7) target bundleno = 4 (0x4), region = 80 }
  0xd0   :  { %302 = vsyncpa [#allocation3], 1 }
  0xd1   :  { %304 = vsyncpa [#allocation3 + $0x1], 1 }

</bundles_post_ra>
